<compile_context>
chip_gen: v5e
topology: v5e:2x2
jax: 0.10.0
libtpu: 0.0.40
codegen_flags: <defaults>
</compile_context>

<pallas_src>
import math

import numpy as np
import jax
import jax.numpy as jnp
from jax.experimental import pallas as pl
from jax.experimental.pallas import tpu as pltpu


# ------------------------------- kernel body ---------------------------------
def _scale_kernel(x_ref, s_ref, o_ref):
    # Pure VPU elementwise multiply; the (1, L) scale row broadcasts over the
    # sublane (row) axis of the tile. Multiply happens in the promoted dtype
    # (x dtype vs. scale dtype), then casts to the output dtype.
    o_ref[...] = (x_ref[...] * s_ref[...]).astype(o_ref.dtype)


def _sublane_multiple(itemsize: int) -> int:
    # f32 -> 8 rows/vreg, bf16 -> 16, int8/fp8 -> 32.
    return max(8, (4 // max(1, itemsize)) * 8)


# --------------------------------- wrapper -----------------------------------
def scale_layer(x, scale, *,
                target_block_bytes=4 << 20,      # ~4 MiB per (rows, L) block
                single_step_max_bytes=1 << 20,   # in+out footprint for un-gridded path
                vmem_limit_cap_bytes=48 << 20):  # safe on v5e/v6e (128 MiB) and v7x (64 MiB)
    """Pallas implementation of ScaleLayer.forward: ``x * scale``.

    Contract: ``scale.shape`` must equal the trailing dims of ``x`` exactly
    (what the module constructor implies). Anything else raises.
    """
    if scale.ndim == 0 or scale.ndim > x.ndim or \
            x.shape[x.ndim - scale.ndim:] != scale.shape:
        raise ValueError(
            f"scale shape {scale.shape} must equal the trailing dims of x {x.shape}")

    orig_shape = x.shape
    itemsize = x.dtype.itemsize
    out_dtype = jnp.result_type(x.dtype, scale.dtype)      # torch-style promotion
    out_itemsize = np.dtype(out_dtype).itemsize
    c = int(np.prod(scale.shape))

    # ---- lane-dense width: fold rows into the lane axis if C % 128 != 0 -----
    L, reps = c, 1
    if c % 128 != 0:
        lc = math.lcm(c, 128)
        if (x.size % lc == 0) and (lc * itemsize <= (1 << 20)):
            L, reps = lc, lc // c
    # TODO(synk): if folding is impossible (x.size not divisible by lcm(C,128)),
    # the last dim stays narrow and stores are masked (correct, just slower).

    x2d = x.reshape(-1, L)
    s_row = scale.reshape(-1)
    if reps > 1:
        s_row = jnp.tile(s_row, reps)
    s_row = s_row.reshape(1, L)

    n = x2d.shape[0]
    x_bytes = n * L * itemsize
    out_bytes = n * L * out_itemsize
    scale_bytes = L * scale.dtype.itemsize
    footprint = x_bytes + out_bytes + scale_bytes

    cost = pl.CostEstimate(flops=n * L, transcendentals=0,
                           bytes_accessed=footprint)

    # ---- adaptive row block for the tiled path -------------------------------
    sub = _sublane_multiple(itemsize)
    row_bytes = L * max(itemsize, out_itemsize)
    br = max(sub, (target_block_bytes // row_bytes) // sub * sub)

    use_single_step = (footprint <= single_step_max_bytes) or (br >= n)

    if use_single_step:
        # Whole array resident in VMEM: one launch, one grid step, lane-dense
        # full-block load/compute/store (only for µs-scale tiny inputs).
        vmem_limit = int(min(max(footprint + (1 << 20), 16 << 20),
                             vmem_limit_cap_bytes))
        out = pl.pallas_call(
            _scale_kernel,
            out_shape=jax.ShapeDtypeStruct((n, L), out_dtype),
            cost_estimate=cost,
            compiler_params=pltpu.CompilerParams(vmem_limit_bytes=vmem_limit),
        )(x2d, s_row)
    else:
        num_steps = -(-n // br)                         # cdiv
        block_in = br * L * itemsize
        block_out = br * L * out_itemsize
        # Deeper pipelining only when blocks are small and there are enough steps.
        bufs = 3 if (block_in + block_out <= (4 << 20) and num_steps >= 4) else 2

        vmem_needed = bufs * (block_in + block_out) + 2 * scale_bytes + (1 << 20)
        vmem_limit = int(min(max(vmem_needed, 16 << 20), vmem_limit_cap_bytes))

        if bufs == 2:
            x_spec = pl.BlockSpec((br, L), lambda i: (i, 0))
            o_spec = pl.BlockSpec((br, L), lambda i: (i, 0))
        else:
            x_spec = pl.BlockSpec((br, L), lambda i: (i, 0),
                                  pipeline_mode=pl.Buffered(bufs))
            o_spec = pl.BlockSpec((br, L), lambda i: (i, 0),
                                  pipeline_mode=pl.Buffered(bufs))

        out = pl.pallas_call(
            _scale_kernel,
            out_shape=jax.ShapeDtypeStruct((n, L), out_dtype),
            grid=(num_steps,),
            in_specs=[x_spec,
                      pl.BlockSpec((1, L), lambda i: (0, 0))],   # scale reused per step
            out_specs=o_spec,
            cost_estimate=cost,
            compiler_params=pltpu.CompilerParams(
                dimension_semantics=("parallel",),
                vmem_limit_bytes=vmem_limit),
        )(x2d, s_row)

    return out.reshape(orig_shape)


# ----------------------------------- test ------------------------------------
if __name__ == "__main__":
    key = jax.random.PRNGKey(0)
    k1, k2, k3, k4 = jax.random.split(key, 4)

    # Case 1: module default (scale filled with init_value=0.001), C=32 is not a
    # multiple of 128 -> lane-folding path (width lcm(32,128)=128).
    x1 = jax.random.normal(k1, (2, 4, 16, 32), jnp.float32)
    s1 = jnp.full((32,), 0.001, jnp.float32)
    y1 = jax.jit(scale_layer)(x1, s1)
    jax.block_until_ready(y1)
    assert y1.shape == x1.shape and y1.dtype == x1.dtype
    assert jnp.allclose(y1, x1 * s1, rtol=1e-6, atol=1e-6)

    # Case 2: multi-dim scale equal to the trailing dims (16, 32) -> C = 512.
    x2 = jax.random.normal(k2, (2, 8, 16, 32), jnp.float32)
    s2 = 0.001 * jax.random.normal(k3, (16, 32), jnp.float32)
    y2 = scale_layer(x2, s2)
    jax.block_until_ready(y2)
    assert y2.shape == x2.shape
    assert jnp.allclose(y2, x2 * s2, rtol=1e-6, atol=1e-6)

    # Case 3: force the tiled / parallel-grid / Buffered(3) path with small knobs.
    x3 = jax.random.normal(k4, (512, 256), jnp.float32)
    s3 = jnp.full((256,), 0.001, jnp.float32)
    y3 = scale_layer(x3, s3,
                     target_block_bytes=64 << 10,
                     single_step_max_bytes=1 << 16)
    jax.block_until_ready(y3)
    assert y3.shape == x3.shape
    assert jnp.allclose(y3, x3 * s3, rtol=1e-6, atol=1e-6)

    print("KERNEL_OK")
</pallas_src>

<mosaic_0001>
module attributes {stable_mosaic.version = 11 : i64} {
  func.func @_scale_kernel(%arg0: memref<32x128xf32, #tpu.memory_space<vmem>>, %arg1: memref<1x128xf32, #tpu.memory_space<vmem>>, %arg2: memref<32x128xf32, #tpu.memory_space<vmem>>) attributes {dimension_semantics = [], scalar_prefetch = 0 : i64, scratch_operands = 0 : i64, tpu.core_type = #tpu.core_type<tc>} {
    %c0 = arith.constant 0 : index
    %c0_0 = arith.constant 0 : index
    %0 = vector.load %arg0[%c0, %c0_0] : memref<32x128xf32, #tpu.memory_space<vmem>>, vector<32x128xf32>
    %c0_1 = arith.constant 0 : index
    %c0_2 = arith.constant 0 : index
    %1 = vector.load %arg1[%c0_1, %c0_2] : memref<1x128xf32, #tpu.memory_space<vmem>>, vector<1x128xf32>
    %2 = vector.broadcast %1 : vector<1x128xf32> to vector<32x128xf32>
    %3 = arith.mulf %0, %2 : vector<32x128xf32>
    %c0_3 = arith.constant 0 : index
    %c0_4 = arith.constant 0 : index
    %4 = vector.load %arg2[%c0_3, %c0_4] : memref<32x128xf32, #tpu.memory_space<vmem>>, vector<32x128xf32>
    tpu.vector_store %arg2[%c0_3, %c0_4], %3 {strides = array<i32>} : memref<32x128xf32, #tpu.memory_space<vmem>>, vector<32x128xf32>,
    return
  }
}

</mosaic_0001>

<bundles_post_ra>
// kernel: tile.9
= control target key start
LH: loop header
LB: loop body
LE: loop exit
PB: predicated region body
PF: predicated region fallthrough
CT: control target
= control target key end

     0   :  { %s37_s8 = smov 32   ;;  %s38_s9 = smov 64   ;;  %vm7_vm0 = vcmask 261120   ;;  %vm13_vm1 = vcmask 1048320   ;;  %vm19_vm2 = vcmask 785920   ;;  %vm25_vm3 = vcmask 523520   ;;  %s55_s0 = inlined_call_operand.vmem [shape: f32[4,32], index: 0, kind: input, shape index: {}]   ;;  %s56_s1 = inlined_call_operand.vmem [shape: f32[1,128], index: 1, kind: output, shape index: {}]  }
   0x1   :  { %v4_v0 = vld [vmem:[%s55_s0] sm:$0xf]  ;;  %s36_s0 = smov 96  }
   0x2   :  { %5 = vst [vmem:[#allocation1] sm:$0xf] %v4_v0 }
   0x9   :  { %v10_v1 = vld [vmem:[#allocation1 + $0x3] sm:$0x1]   ;;  %v22_v2 = vld [vmem:[#allocation1 + $0x1] sm:$0x1]   ;;  %v16_v3 = vld [vmem:[#allocation1 + $0x2] sm:$0x1]  }
   0xa   :  { %11 = vrot.lane.b32.xlu0 %v10_v1, %s36_s0  ;;  %23 = vrot.lane.b32.xlu1 %v22_v2, %s37_s8  ;;  %v6_v4 = vld [vmem:[#allocation1] sm:$0x1]  }
   0xb   :  { %8 = vst.msk [vmem:[#allocation0] sm:$0x1] %vm7_vm0, %v6_v4  }
  0x12   :  { %17 = vrot.lane.b32.xlu0 %v16_v3, %s38_s9 }
  0x7c   :  { %v12_v5 = vpop.permute.xlu0 %11   ;;  %v24_v6 = vpop.permute.xlu1 %23  }
  0x7d   :  { %14 = vst.msk [vmem:[#allocation0] sm:$0x1] %vm13_vm1, %v12_v5  }
  0x84   :  { %v18_v7 = vpop.permute.xlu0 %17  }
  0x85   :  { %20 = vst.msk [vmem:[#allocation0] sm:$0x1] %vm19_vm2, %v18_v7  }
  0x86   :  { %26 = vst.msk [vmem:[#allocation0] sm:$0x1] %vm25_vm3, %v24_v6  }
  0x8d   :  { %v29_v8 = vld [vmem:[#allocation0] sm:$0x1] }
  0x8e   :  { %32 = vst [vmem:[%s56_s1] sm:$0x1] %v29_v8 }

// kernel: tile.8
= control target key start
LH: loop header
LB: loop body
LE: loop exit
PB: predicated region body
PF: predicated region fallthrough
CT: control target
= control target key end

     0   :  { %2 = vsyncpa [#allocation1], 0  ;;  %s48_s8 = smov [#allocation0]   ;;  %s65_s0 = inlined_call_operand.hbm [shape: f32[32], index: 0, kind: input, shape index: {}]   ;;  %s66_s1 = inlined_call_operand.vmem [shape: f32[4,32], index: 1, kind: output, shape index: {}]  }
   0x1   :  { %s8_s0 = sshll.u32 %s65_s0, 4  ;;  %s10_s9 = sshll.u32 %s48_s8, 4  ;;  %s9_s0 = int_to_ptr.hbm [resolvable:$true] %s8_s0  ;;  %s11_s9 = int_to_ptr.vmem [resolvable:$true] %s10_s9 }
   0x2   :  { %13 = dma.hbm_to_vmem [thread:$0]  %s9_s0, 16, %s11_s9, [#allocation1]  }
   0x3   :  { %46 = dma.done.wait [#allocation1], 16  }
   0x4   :  { %47 = vsyncadd [#allocation1], 4294967280  ;;  %v18_v0 = vld [vmem:[#allocation0] ss:$0 sm:$0xff] }
   0x5   :  { %19 = vst [vmem:[%s66_s1] sm:$0xf] %v18_v0 }
   0x6   :  { %20 = vsyncpa [#allocation1], 1 }

// kernel: scale_layer.1
= control target key start
LH: loop header
LB: loop body
LE: loop exit
PB: predicated region body
PF: predicated region fallthrough
CT: control target
= control target key end

     0   :  { %s74_s0 = inlined_call_operand.vmem [shape: f32[32,128], index: 0, kind: input, shape index: {}]   ;;  %s75_s1 = inlined_call_operand.vmem [shape: f32[1,128], index: 1, kind: input, shape index: {}]   ;;  %s76_s2 = inlined_call_operand.vmem [shape: f32[32,128], index: 2, kind: output, shape index: {}]  }
   0x1   :  { %v11_v0 = vld [vmem:[%s74_s0] sm:$0xff]  ;;  %v12_v2 = vld [vmem:[%s74_s0 + $0x8] sm:$0xff]  ;;  %v13_v3 = vld [vmem:[%s74_s0 + $0x10] sm:$0xff] }
   0x2   :  { %v31_v1 = vld [vmem:[%s75_s1] ss:$0 sm:$0xff]  ;;  %v14_v4 = vld [vmem:[%s74_s0 + $0x18] sm:$0xff] }
   0x3   :  { %v19_v5 = vmul.f32 %v31_v1, %v11_v0  ;;  %v20_v6 = vmul.f32 %v31_v1, %v12_v2  ;;  %v21_v7 = vmul.f32 %v31_v1, %v13_v3  ;;  %v22_v8 = vmul.f32 %v31_v1, %v14_v4 }
   0x5   :  { %23 = vst [vmem:[%s76_s2] sm:$0xff] %v19_v5 }
   0x6   :  { %24 = vst [vmem:[%s76_s2 + $0x8] sm:$0xff] %v20_v6 }
   0x7   :  { %25 = vst [vmem:[%s76_s2 + $0x10] sm:$0xff] %v21_v7 }
   0x8   :  { %26 = vst [vmem:[%s76_s2 + $0x18] sm:$0xff] %v22_v8 }

</bundles_post_ra>
